<compile_context>
chip_gen: v7x
topology: tpu7x:2x2x1
jax: 0.10.0
libtpu: 0.0.40
codegen_flags: <defaults>
</compile_context>

<pallas_src>
import functools
import math

import jax
import jax.numpy as jnp
from jax.experimental import pallas as pl
from jax.experimental.pallas import tpu as pltpu


def _round_up(x, m):
    return ((x + m - 1) // m) * m


def _cdiv(a, b):
    return (a + b - 1) // b


def _ff_kernel(x_ref, w1x_ref, w1g_ref, b1x_ref, b1g_ref, w2_ref, b2_ref,
               o_ref, *acc_scratch, compute_dtype, single_step):
    # x_ref:   (TM, D)  compute_dtype (pre-cast in the wrapper)
    # w1x/w1g: (D, TH)  compute_dtype weight slices for the GEGLU halves
    # b1x/b1g: (1, TH)  f32
    # w2_ref:  (TH, D)  compute_dtype
    # b2_ref:  (1, D)   f32
    # o_ref:   (TM, D)  output tile (resident across the hidden axis)
    # acc_scratch: optional (TM, D) f32 accumulator (only multi-step + non-f32
    #              output; otherwise we accumulate into o_ref directly).
    x = x_ref[...]
    xs = jnp.dot(x, w1x_ref[...], preferred_element_type=jnp.float32) + b1x_ref[...]
    gates = jnp.dot(x, w1g_ref[...], preferred_element_type=jnp.float32) + b1g_ref[...]

    # Exact GELU (erf form) in f32, matching torch.nn.functional.gelu default.
    inv_sqrt2 = jnp.float32(1.0 / math.sqrt(2.0))
    gelu_gates = 0.5 * gates * (1.0 + jax.lax.erf(gates * inv_sqrt2))
    g = (xs * gelu_gates).astype(compute_dtype)

    y = jnp.dot(g, w2_ref[...], preferred_element_type=jnp.float32)

    if single_step:
        # Whole hidden dim in one step: weights resident, write the tile once.
        o_ref[...] = (y + b2_ref[...]).astype(o_ref.dtype)
    else:
        acc_ref = acc_scratch[0] if acc_scratch else o_ref
        h = pl.program_id(1)

        @pl.when(h == 0)
        def _():
            acc_ref[...] = jnp.zeros_like(acc_ref)

        acc_ref[...] += y

        @pl.when(h == pl.num_programs(1) - 1)
        def _():
            # b2 added exactly once, on the final hidden step.
            if acc_scratch:
                o_ref[...] = (acc_ref[...] + b2_ref[...]).astype(o_ref.dtype)
            else:
                o_ref[...] = o_ref[...] + b2_ref[...]


def feedforward(x, w1, b1, w2, b2, *, row_tile=512, hidden_tile=512,
                compute_dtype=jnp.bfloat16):
    """x: (B, S, D). w1: (D, 2H), b1: (2H,), w2: (H, D), b2: (D,).
    Returns (B, S, D). Computes Linear -> GEGLU -> Linear (y = x @ W + b)."""
    B, S, D = x.shape
    N = B * S
    H2 = w1.shape[1]
    H = w2.shape[0]
    assert H2 == 2 * H and w1.shape[0] == D and w2.shape[1] == D

    cbytes = jnp.dtype(compute_dtype).itemsize
    obytes = jnp.dtype(x.dtype).itemsize

    # ---- row tiling: multiples of 16 (bf16 sublane packing); prefer >= 2
    # tiles so the "parallel" axis shards across v7x's two TensorCores.
    n16 = _round_up(N, 16)
    n_tiles = _cdiv(n16, min(row_tile, n16))
    if n_tiles == 1 and n16 >= 32:
        n_tiles = 2
    tm = _round_up(_cdiv(n16, n_tiles), 16)
    n_pad = n_tiles * tm

    # ---- VMEM budget: ~0.8 of the queried physical capacity (leaves headroom
    # for Mosaic scratch); 64 MiB fallback keeps the limit v7x-safe.
    try:
        vmem_cap = int(pltpu.get_tpu_info().vmem_capacity_bytes)
    except Exception:
        vmem_cap = 64 * 2**20
    vmem_limit = int(0.8 * vmem_cap)

    def vmem_est(tm_, th_):
        est = 2 * tm_ * D * cbytes                     # x tiles (double-buffered)
        est += 2 * (2 * D * th_ + th_ * D) * cbytes    # W1x + W1g + W2 tiles
        est += 2 * (2 * th_ + D) * 4                   # biases
        est += 2 * tm_ * D * obytes                    # out tiles
        est += tm_ * D * 4                             # possible accumulator
        est += 4 * tm_ * th_ * 4                       # xs/gates/gelu/g temporaries
        return est

    # ---- hidden tiling: keep all weights VMEM-resident (single hidden step,
    # weights DMA'd once) whenever they fit; else stream 128-aligned slices.
    if vmem_est(tm, H) <= int(0.9 * vmem_limit):
        th, h_pad = H, H
    else:
        th = _round_up(min(hidden_tile, H), 128)
        while th > 128 and vmem_est(tm, th) > int(0.9 * vmem_limit):
            th = _round_up(th // 2, 128)
        h_pad = _round_up(H, th)
    n_h = h_pad // th
    single_step = n_h == 1

    # ---- weights: pre-cast to compute dtype (halves weight HBM traffic and
    # VMEM) and pre-split into GEGLU halves; biases stay f32.
    w1x = w1[:, :H].astype(compute_dtype)
    w1g = w1[:, H:].astype(compute_dtype)
    b1x = b1[:H].reshape(1, H).astype(jnp.float32)
    b1g = b1[H:].reshape(1, H).astype(jnp.float32)
    w2c = w2.astype(compute_dtype)
    b2c = b2.reshape(1, D).astype(jnp.float32)
    if h_pad != H:
        p = h_pad - H
        w1x = jnp.pad(w1x, ((0, 0), (0, p)))
        w1g = jnp.pad(w1g, ((0, 0), (0, p)))
        b1x = jnp.pad(b1x, ((0, 0), (0, p)))
        b1g = jnp.pad(b1g, ((0, 0), (0, p)))
        w2c = jnp.pad(w2c, ((0, p), (0, 0)))

    # ---- activations: one cast in the wrapper (pad only if needed) so the
    # kernel never re-casts x per hidden step.
    x2 = x.reshape(N, D).astype(compute_dtype)
    if n_pad != N:
        x2 = jnp.pad(x2, ((0, n_pad - N), (0, 0)))

    out_dtype = x.dtype
    use_scratch = (not single_step) and (jnp.dtype(out_dtype) != jnp.float32)
    scratch_shapes = [pltpu.VMEM((tm, D), jnp.float32)] if use_scratch else []

    # ---- cost estimate: weights are re-read once per row tile when the hidden
    # axis is streamed, once when resident.
    weight_reads = 1 if single_step else n_pad // tm
    cost = pl.CostEstimate(
        flops=6 * n_pad * D * h_pad,                   # 2*N*D*(2H) + 2*N*H*D
        transcendentals=n_pad * h_pad,                 # erf
        bytes_accessed=int(n_pad * D * cbytes
                           + weight_reads * 3 * D * h_pad * cbytes
                           + (2 * h_pad + D) * 4
                           + n_pad * D * obytes),
    )

    kernel = functools.partial(_ff_kernel, compute_dtype=compute_dtype,
                               single_step=single_step)
    out = pl.pallas_call(
        kernel,
        out_shape=jax.ShapeDtypeStruct((n_pad, D), out_dtype),
        grid_spec=pltpu.PrefetchScalarGridSpec(
            num_scalar_prefetch=0,
            grid=(n_pad // tm, n_h),
            in_specs=[
                pl.BlockSpec((tm, D), lambda i, h: (i, 0)),    # x rows
                pl.BlockSpec((D, th), lambda i, h: (0, h)),    # W1 "xs" slice
                pl.BlockSpec((D, th), lambda i, h: (0, h)),    # W1 "gates" slice
                pl.BlockSpec((1, th), lambda i, h: (0, h)),    # b1 "xs" slice
                pl.BlockSpec((1, th), lambda i, h: (0, h)),    # b1 "gates" slice
                pl.BlockSpec((th, D), lambda i, h: (h, 0)),    # W2 slice
                pl.BlockSpec((1, D), lambda i, h: (0, 0)),     # b2
            ],
            out_specs=pl.BlockSpec((tm, D), lambda i, h: (i, 0)),
            scratch_shapes=scratch_shapes,
        ),
        compiler_params=pltpu.CompilerParams(
            dimension_semantics=("parallel", "arbitrary"),
            vmem_limit_bytes=vmem_limit),
        cost_estimate=cost,
    )(x2, w1x, w1g, b1x, b1g, w2c, b2c)

    if n_pad != N:
        out = out[:N]
    return out.reshape(B, S, D)


def init_params(key, dim, mult=4):
    """nn.Linear-style uniform(-1/sqrt(fan_in), ...) init.
    Weights are stored as (in_features, out_features)."""
    hidden = dim * mult
    k1, k2, k3, k4 = jax.random.split(key, 4)
    bound1 = 1.0 / math.sqrt(dim)
    w1 = jax.random.uniform(k1, (dim, hidden * 2), jnp.float32, -bound1, bound1)
    b1 = jax.random.uniform(k2, (hidden * 2,), jnp.float32, -bound1, bound1)
    bound2 = 1.0 / math.sqrt(hidden)
    w2 = jax.random.uniform(k3, (hidden, dim), jnp.float32, -bound2, bound2)
    b2 = jax.random.uniform(k4, (dim,), jnp.float32, -bound2, bound2)
    return w1, b1, w2, b2


def feedforward_ref(x, w1, b1, w2, b2, compute_dtype=jnp.float32):
    """Pure-JAX reference (same semantics as the PyTorch module); optional
    bf16-matmul path mirrors the kernel's numerics."""
    cd = compute_dtype
    h = jnp.dot(x.astype(cd), w1.astype(cd),
                preferred_element_type=jnp.float32) + b1
    H = w2.shape[0]
    xs, gates = h[..., :H], h[..., H:]
    g = xs * jax.nn.gelu(gates, approximate=False)
    return jnp.dot(g.astype(cd), w2.astype(cd),
                   preferred_element_type=jnp.float32) + b2


if __name__ == "__main__":
    key = jax.random.PRNGKey(0)
    kx, kp = jax.random.split(key)

    B, S, dim, mult = 2, 8, 32, 4
    x = jax.random.normal(kx, (B, S, dim), jnp.float32)
    w1, b1, w2, b2 = init_params(kp, dim, mult)

    out = jax.block_until_ready(feedforward(x, w1, b1, w2, b2))
    assert out.shape == (B, S, dim)

    # Check against a reference using the same bf16-matmul / f32-accumulate path.
    ref_bf16 = feedforward_ref(x, w1, b1, w2, b2, compute_dtype=jnp.bfloat16)
    assert jnp.allclose(out, ref_bf16, atol=1e-2, rtol=1e-2), "mismatch vs bf16 ref"

    # Sanity check against the exact f32 reference (looser: bf16 matmul rounding).
    ref_f32 = feedforward_ref(x, w1, b1, w2, b2, compute_dtype=jnp.float32)
    assert jnp.allclose(out, ref_f32, atol=5e-2, rtol=5e-2), "mismatch vs f32 ref"

    print("KERNEL_OK")
</pallas_src>

<mosaic_0001>
module attributes {stable_mosaic.version = 11 : i64} {
  func.func @_ff_kernel(%arg0: i32, %arg1: i32, %arg2: memref<16x32xbf16, #tpu.memory_space<vmem>>, %arg3: memref<32x128xbf16, #tpu.memory_space<vmem>>, %arg4: memref<32x128xbf16, #tpu.memory_space<vmem>>, %arg5: memref<1x128xf32, #tpu.memory_space<vmem>>, %arg6: memref<1x128xf32, #tpu.memory_space<vmem>>, %arg7: memref<128x32xbf16, #tpu.memory_space<vmem>>, %arg8: memref<1x32xf32, #tpu.memory_space<vmem>>, %arg9: memref<16x32xf32, #tpu.memory_space<vmem>>) attributes {dimension_semantics = [#tpu.dimension_semantics<parallel>, #tpu.dimension_semantics<arbitrary>], iteration_bounds = array<i64: 1, 1>, scalar_prefetch = 0 : i64, scratch_operands = 0 : i64, tpu.core_type = #tpu.core_type<tc>, window_params = [{transform_indices = @transform_0, window_bounds = array<i64: 16, 32>}, {transform_indices = @transform_1, window_bounds = array<i64: 32, 128>}, {transform_indices = @transform_2, window_bounds = array<i64: 32, 128>}, {transform_indices = @transform_3, window_bounds = array<i64: 1, 128>}, {transform_indices = @transform_4, window_bounds = array<i64: 1, 128>}, {transform_indices = @transform_5, window_bounds = array<i64: 128, 32>}, {pipeline_mode = #tpu.pipeline_mode<synchronous>, transform_indices = @transform_6, window_bounds = array<i64: 1, 32>}, {transform_indices = @transform_7, window_bounds = array<i64: 16, 32>}]} {
    %c0 = arith.constant 0 : index
    %c0_0 = arith.constant 0 : index
    %0 = vector.load %arg2[%c0, %c0_0] : memref<16x32xbf16, #tpu.memory_space<vmem>>, vector<16x32xbf16>
    %c0_1 = arith.constant 0 : index
    %c0_2 = arith.constant 0 : index
    %1 = vector.load %arg3[%c0_1, %c0_2] : memref<32x128xbf16, #tpu.memory_space<vmem>>, vector<32x128xbf16>
    %cst = arith.constant dense<0.000000e+00> : vector<16x128xf32>
    %2 = tpu.matmul %0, %1, %cst {dimension_numbers = #tpu.dot_dimension_numbers<[1], [0], [0], [1], [0, 0, 1, 1], [], []>} : vector<16x32xbf16>, vector<32x128xbf16>, vector<16x128xf32> -> vector<16x128xf32>
    %c0_3 = arith.constant 0 : index
    %c0_4 = arith.constant 0 : index
    %3 = vector.load %arg5[%c0_3, %c0_4] : memref<1x128xf32, #tpu.memory_space<vmem>>, vector<1x128xf32>
    %4 = vector.broadcast %3 : vector<1x128xf32> to vector<16x128xf32>
    %5 = arith.addf %2, %4 : vector<16x128xf32>
    %c0_5 = arith.constant 0 : index
    %c0_6 = arith.constant 0 : index
    %6 = vector.load %arg4[%c0_5, %c0_6] : memref<32x128xbf16, #tpu.memory_space<vmem>>, vector<32x128xbf16>
    %cst_7 = arith.constant dense<0.000000e+00> : vector<16x128xf32>
    %7 = tpu.matmul %0, %6, %cst_7 {dimension_numbers = #tpu.dot_dimension_numbers<[1], [0], [0], [1], [0, 0, 1, 1], [], []>} : vector<16x32xbf16>, vector<32x128xbf16>, vector<16x128xf32> -> vector<16x128xf32>
    %c0_8 = arith.constant 0 : index
    %c0_9 = arith.constant 0 : index
    %8 = vector.load %arg6[%c0_8, %c0_9] : memref<1x128xf32, #tpu.memory_space<vmem>>, vector<1x128xf32>
    %9 = vector.broadcast %8 : vector<1x128xf32> to vector<16x128xf32>
    %10 = arith.addf %7, %9 : vector<16x128xf32>
    %cst_10 = arith.constant 5.000000e-01 : f32
    %11 = vector.broadcast %cst_10 : f32 to vector<16x128xf32>
    %12 = arith.mulf %11, %10 : vector<16x128xf32>
    %cst_11 = arith.constant 0.707106769 : f32
    %13 = vector.broadcast %cst_11 : f32 to vector<16x128xf32>
    %14 = arith.mulf %10, %13 : vector<16x128xf32>
    %15 = math.erf %14 : vector<16x128xf32>
    %cst_12 = arith.constant 1.000000e+00 : f32
    %16 = vector.broadcast %cst_12 : f32 to vector<16x128xf32>
    %17 = arith.addf %16, %15 : vector<16x128xf32>
    %18 = arith.mulf %12, %17 : vector<16x128xf32>
    %19 = arith.mulf %5, %18 : vector<16x128xf32>
    %20 = arith.truncf %19 : vector<16x128xf32> to vector<16x128xbf16>
    %c0_13 = arith.constant 0 : index
    %c0_14 = arith.constant 0 : index
    %21 = vector.load %arg7[%c0_13, %c0_14] : memref<128x32xbf16, #tpu.memory_space<vmem>>, vector<128x32xbf16>
    %cst_15 = arith.constant dense<0.000000e+00> : vector<16x32xf32>
    %22 = tpu.matmul %20, %21, %cst_15 {dimension_numbers = #tpu.dot_dimension_numbers<[1], [0], [0], [1], [0, 0, 1, 1], [], []>} : vector<16x128xbf16>, vector<128x32xbf16>, vector<16x32xf32> -> vector<16x32xf32>
    %c0_16 = arith.constant 0 : index
    %c0_17 = arith.constant 0 : index
    %23 = vector.load %arg8[%c0_16, %c0_17] : memref<1x32xf32, #tpu.memory_space<vmem>>, vector<1x32xf32>
    %24 = vector.broadcast %23 : vector<1x32xf32> to vector<16x32xf32>
    %25 = arith.addf %22, %24 : vector<16x32xf32>
    %c0_18 = arith.constant 0 : index
    %c0_19 = arith.constant 0 : index
    %26 = vector.load %arg9[%c0_18, %c0_19] : memref<16x32xf32, #tpu.memory_space<vmem>>, vector<16x32xf32>
    tpu.vector_store %arg9[%c0_18, %c0_19], %25 {strides = array<i32>} : memref<16x32xf32, #tpu.memory_space<vmem>>, vector<16x32xf32>,
    return
  }
  func.func @transform_0(%arg0: i32, %arg1: i32) -> (i32, i32) {
    %c0_i32 = arith.constant 0 : i32
    %c0_i32_0 = arith.constant 0 : i32
    return %arg0, %c0_i32 : i32, i32
  }
  func.func @transform_1(%arg0: i32, %arg1: i32) -> (i32, i32) {
    %c0_i32 = arith.constant 0 : i32
    %c0_i32_0 = arith.constant 0 : i32
    return %c0_i32, %arg1 : i32, i32
  }
  func.func @transform_2(%arg0: i32, %arg1: i32) -> (i32, i32) {
    %c0_i32 = arith.constant 0 : i32
    %c0_i32_0 = arith.constant 0 : i32
    return %c0_i32, %arg1 : i32, i32
  }
  func.func @transform_3(%arg0: i32, %arg1: i32) -> (i32, i32) {
    %c0_i32 = arith.constant 0 : i32
    %c0_i32_0 = arith.constant 0 : i32
    return %c0_i32, %arg1 : i32, i32
  }
  func.func @transform_4(%arg0: i32, %arg1: i32) -> (i32, i32) {
    %c0_i32 = arith.constant 0 : i32
    %c0_i32_0 = arith.constant 0 : i32
    return %c0_i32, %arg1 : i32, i32
  }
  func.func @transform_5(%arg0: i32, %arg1: i32) -> (i32, i32) {
    %c0_i32 = arith.constant 0 : i32
    %c0_i32_0 = arith.constant 0 : i32
    return %arg1, %c0_i32 : i32, i32
  }
  func.func @transform_6(%arg0: i32, %arg1: i32) -> (i32, i32) {
    %c0_i32 = arith.constant 0 : i32
    %c0_i32_0 = arith.constant 0 : i32
    %c0_i32_1 = arith.constant 0 : i32
    return %c0_i32, %c0_i32_0 : i32, i32
  }
  func.func @transform_7(%arg0: i32, %arg1: i32) -> (i32, i32) {
    %c0_i32 = arith.constant 0 : i32
    %c0_i32_0 = arith.constant 0 : i32
    return %arg0, %c0_i32 : i32, i32
  }
}

</mosaic_0001>

<bundles_post_ra>
// kernel: tpu_custom_call.1
= control target key start
LH: loop header
LB: loop body
LE: loop exit
PB: predicated region body
PF: predicated region fallthrough
CT: control target
= control target key end

     0   :  { %v425_v1 = vmov 0.0   ;;  %vm426_vm0 = vmmov 0   ;;  %vm58_vm1 = vcmask 261120   ;;  %s534_s0 = inlined_call_operand.vmem [shape: bf16[16,32], index: 0, kind: input, shape index: {}]   ;;  %s535_s1 = inlined_call_operand.vmem [shape: bf16[32,128], index: 1, kind: input, shape index: {}]   ;;  %s536_s2 = inlined_call_operand.vmem [shape: bf16[32,128], index: 2, kind: input, shape index: {}]   ;;  %s537_s3 = inlined_call_operand.vmem [shape: f32[1,128], index: 3, kind: input, shape index: {}]   ;;  %s538_s4 = inlined_call_operand.vmem [shape: f32[1,128], index: 4, kind: input, shape index: {}]   ;;  %s539_s5 = inlined_call_operand.vmem [shape: bf16[128,32], index: 5, kind: input, shape index: {}]   ;;  %s540_s6 = inlined_call_operand.vmem [shape: f32[1,32], index: 6, kind: input, shape index: {}]   ;;  %s541_s7 = inlined_call_operand.hbm [shape: f32[16,32], index: 7, kind: output, shape index: {}]  }
   0x1   :  { %v384_v0 = vld [vmem:[%s535_s1] sm:$0xff]   ;;  %343 = vmatprep.subr.bf16.mxu1 %v425_v1  ;;  %359 = vmatprep.subr.bf16.mxu0 %v425_v1  ;;  %v385_v2 = vld [vmem:[%s535_s1 + $0x8] sm:$0xff]  }
   0x2   :  { %344 = vmatpush3.bf16.msra.mxu1 %v384_v0  ;;  %347 = vmatprep.mubr.msk.bf16.mxu1 %vm426_vm0, %v425_v1  ;;  %v386_v3 = vld [vmem:[%s534_s0] sm:$0xff]   ;;  %v388_v5 = vld [vmem:[%s536_s2 + $0x8] sm:$0xff]  }
   0x3   :  { %345 = vmatprep.subr.bf16.mxu1 %v425_v1  ;;  %375 = vmatprep.mubr.msk.bf16.mxu0 %vm426_vm0, %v425_v1  ;;  %v387_v4 = vld [vmem:[%s536_s2] sm:$0xff]  }
   0x6   :  { %346 = vmatpush3.bf16.msra.mxu1 %v385_v2 }
   0x7   :  { %351 = vmatprep.subr.bf16.mxu1 %v425_v1 }
   0x9   :  { %348 = vmatmul.mubr.msk.bf16.vlgmr.msra.gmra.mrb[0].mxu1 %vm58_vm1, %v386_v3 }
   0xa   :  { %352 = vmatpush3.bf16.msra.mxu1 %v387_v4  ;;  %355 = vmatprep.mubr.msk.bf16.mxu1 %vm426_vm0, %v425_v1 }
   0xb   :  { %12 = vsyncpa [#allocation3], 0  ;;  %353 = vmatprep.subr.bf16.mxu1 %v425_v1  ;;  %v389_v6 = vld [vmem:[%s539_s5] sm:$0xff]   ;;  %v390_v7 = vld [vmem:[%s539_s5 + $0x8] sm:$0xff]   ;;  %s427_s28 = smov [#allocation2]  }
   0xc   :  { %360 = vmatpush3.bf16.msra.mxu0 %v389_v6  ;;  %v391_v8 = vld [vmem:[%s539_s5 + $0x10] sm:$0xff]   ;;  %v392_v9 = vld [vmem:[%s539_s5 + $0x18] sm:$0xff]   ;;  %v393_v10 = vld [vmem:[%s539_s5 + $0x20] sm:$0xff]   ;;  %s299_s29 = sshll.u32 %s427_s28, 4  ;;  %s300_s29 = int_to_ptr.vmem [resolvable:$true] %s299_s29 }
   0xd   :  { %361 = vmatprep.subr.bf16.mxu0 %v425_v1  ;;  %v394_v11 = vld [vmem:[%s539_s5 + $0x28] sm:$0xff]   ;;  %v395_v12 = vld [vmem:[%s539_s5 + $0x30] sm:$0xff]   ;;  %v396_v13 = vld [vmem:[%s539_s5 + $0x38] sm:$0xff]   ;;  %p406_p1 = scmp.lt.s32.totalorder %s300_s29, %s300_s29 }
   0xe   :  { %354 = vmatpush3.bf16.msra.mxu1 %v388_v5  ;;  %v315_v18 = vld [vmem:[%s538_s4] ss:$0 sm:$0xff] }
   0xf   :  { %v310_v28 = vld [vmem:[%s537_s3] ss:$0 sm:$0xff]  ;;  %s401_s3 = scalar_lea.vmem %s300_s29, 256 }
  0x10   :  { %362 = vmatpush3.bf16.msra.mxu0 %v390_v7  ;;  %v319_v41 = vld [vmem:[%s540_s6] ss:$0 sm:$0xff]  ;;  %p402_p0 = scmp.ne.s32.totalorder %s300_s29, %s401_s3  ;;  %p407_p2 = scmp.lt.s32.totalorder %s401_s3, %s401_s3 }
  0x11   :  { %356 = vmatmul.mubr.msk.bf16.vlgmr.msra.gmra.mrb[4].mxu1 %vm58_vm1, %v386_v3  ;;  %363 = vmatprep.subr.bf16.mxu0 %v425_v1 }
  0x12   :  { %p408_p3 = por %p407_p2, %p406_p1 }
  0x14   :  { %364 = vmatpush3.bf16.msra.mxu0 %v391_v8  ;;  %p409_p4 = pnand %p408_p3, %p402_p0 }
  0x15   :  { %365 = vmatprep.subr.bf16.mxu0 %v425_v1 }
  0x18   :  { %366 = vmatpush3.bf16.msra.mxu0 %v392_v9 }
  0x19   :  { %367 = vmatprep.subr.bf16.mxu0 %v425_v1 }
  0x1c   :  { %368 = vmatpush3.bf16.msra.mxu0 %v393_v10 }
  0x1d   :  { %369 = vmatprep.subr.bf16.mxu0 %v425_v1 }
  0x20   :  { %370 = vmatpush3.bf16.msra.mxu0 %v394_v11 }
  0x21   :  { %371 = vmatprep.subr.bf16.mxu0 %v425_v1 }
  0x24   :  { %372 = vmatpush3.bf16.msra.mxu0 %v395_v12 }
  0x25   :  { %373 = vmatprep.subr.bf16.mxu0 %v425_v1 }
  0x28   :  { %374 = vmatpush3.bf16.msra.mxu0 %v396_v13 }
  0xdc   :  { %v96_v14 = vpop.f32.mrb[0].mxu1 }
  0xdd   :  { %v349_v15 = vpop.f32.mrb[1].mxu1  ;;  %v97_v32 = vadd.f32 %v310_v28, %v96_v14 }
  0xde   :  { %v99_v16 = vpop.f32.mrb[2].mxu1 }
  0xdf   :  { %v350_v17 = vpop.f32.mrb[3].mxu1  ;;  %v100_v36 = vadd.f32 %v310_v28, %v99_v16 }
  0xe4   :  { %v160_v19 = vpop.f32.mrb[4].mxu1 }
  0xe5   :  { %v161_v20 = vadd.f32 %v315_v18, %v160_v19  ;;  %v357_v21 = vpop.f32.mrb[5].mxu1 }
  0xe6   :  { %v163_v22 = vpop.f32.mrb[6].mxu1 }
  0xe7   :  { %v169_v23 = vmul.f32 0.70710677, %v161_v20  ;;  %v164_v24 = vadd.f32 %v315_v18, %v163_v22  ;;  %v358_v25 = vpop.f32.mrb[7].mxu1  ;;  %v167_v29 = vmul.f32 0.5, %v161_v20 }
  0xe9   :  { %397 = verf.f32 %v169_v23  ;;  %v170_v26 = vmul.f32 0.70710677, %v164_v24  ;;  %v168_v34 = vmul.f32 0.5, %v164_v24 }
  0xeb   :  { %399 = verf.f32 %v170_v26 }
  0xf3   :  { %v398_v27 = vpop.eup %397 }
  0xf4   :  { %v173_v30 = vadd.f32 1.0, %v398_v27 }
  0xf5   :  { %v400_v31 = vpop.eup %399 }
  0xf6   :  { %v175_v33 = vmul.f32 %v173_v30, %v167_v29  ;;  %v174_v35 = vadd.f32 1.0, %v400_v31 }
  0xf8   :  { %v176_v37 = vmul.f32 %v174_v35, %v168_v34  ;;  %v177_v38 = vmul.f32 %v175_v33, %v97_v32 }
  0xfa   :  { %v178_v39 = vmul.f32 %v176_v37, %v100_v36 }
  0xfc   :  { %v179_v40 = vpack.c.bf16 %v178_v39, %v177_v38 }
  0xfe   :  { %376 = vmatmul.mubr.bf16.vlgmr.msra.gmra.mrb[0].mxu0 %v179_v40 }
 0x1d1   :  { %v285_v42 = vpop.f32.mrb[0].mxu0 }
 0x1d2   :  { %v286_v43 = vadd.f32 %v319_v41, %v285_v42  ;;  %v377_v44 = vpop.f32.mrb[1].mxu0 }
 0x1d3   :  { %v288_v45 = vpop.f32.mrb[2].mxu0 }
 0x1d4   :  { %292 = vst.msk [vmem:[#allocation2] sm:$0xff] %vm58_vm1, %v286_v43  ;;  %v289_v46 = vadd.f32 %v319_v41, %v288_v45  ;;  %v378_v47 = vpop.f32.mrb[3].mxu0 }
 0x1d6   :  { %293 = vst.msk [vmem:[#allocation2 + $0x8] sm:$0xff] %vm58_vm1, %v289_v46 }
 0x1d7   :  { %412 = shalt.err (!%p409_p4)
}
 0x1d8   :  { %s413_s8 = scalar_lea.hbm %s541_s7, 256 }
 0x1d9   :  { %p414_p5 = scmp.ne.s32.totalorder %s541_s7, %s413_s8  ;;  %p417_p6 = scmp.lt.u32.totalorder %s413_s8, %s541_s7 }
 0x1db   :  { %p419_p7 = pnand %p417_p6, %p414_p5 }
 0x1dd   :  { %422 = shalt.err (!%p419_p7)
}
 0x1de   :  { %s428_s11 = smov 128   ;;  %s429_s12 = smov 8  }
 0x1df   :  { %305 = dma.vmem_to_hbm [thread:$0]  %s300_s29, 256, %s541_s7, [#allocation3], %s428_s11, %s428_s11, %s429_s12  }
 0x1e0   :  { %423 = dma.done.wait [#allocation3], 256  }
 0x1e1   :  { %424 = vsyncadd [#allocation3], 4294967040 }
 0x1e2   :  { %309 = vsyncpa [#allocation3], 1 }

</bundles_post_ra>
